<compile_context>
chip_gen: v7x
topology: tpu7x:2x2x1
jax: 0.10.0
libtpu: 0.0.40
codegen_flags: <defaults>
</compile_context>

<pallas_src>
import functools
import math

import jax
import jax.numpy as jnp
from jax.experimental import pallas as pl
from jax.experimental.pallas import tpu as pltpu


# --------------------------------------------------------------------------
# pltpu.roll direction probe (once per process, cached)
# --------------------------------------------------------------------------
# The conv taps need lane shifts with exact jnp.roll semantics
# (out[..., t] = in[..., t - shift]).  pltpu.roll is the XLU lane-rotate; we
# probe its rotation direction once so the kernel is robust to either rotate
# convention across Mosaic versions.  Cached in a process global, so it never
# runs on the steady-state hot path.
_ROLL_MATCHES_JNP = None


def _roll_probe_kernel(x_ref, o_ref):
    o_ref[...] = pltpu.roll(x_ref[...], shift=1, axis=1)


def _roll_matches_jnp_convention():
    global _ROLL_MATCHES_JNP
    if _ROLL_MATCHES_JNP is None:
        x = jnp.broadcast_to(jnp.arange(128, dtype=jnp.float32)[None, :], (8, 128))
        y = pl.pallas_call(
            _roll_probe_kernel,
            out_shape=jax.ShapeDtypeStruct((8, 128), jnp.float32),
        )(x)
        # jnp.roll(x, 1, axis=1)[0, 1] == 0.0; the opposite rotation gives 2.0.
        _ROLL_MATCHES_JNP = bool(float(y[0, 1]) == 0.0)
    return _ROLL_MATCHES_JNP


# --------------------------------------------------------------------------
# Pallas kernel
# --------------------------------------------------------------------------
def _duration_encoder_kernel(x_ref, wlin_ref, blin_ref, w1_ref, w2_ref,
                             wout_ref, bout_ref, o_ref, tap1_ref, tap2_ref,
                             *, seq_pad, seq_len, prev_shift, next_shift):
    nc = o_ref.shape[1]
    c_lin = wlin_ref.shape[0]      # 24
    c1 = w1_ref.shape[0]           # 32

    # Per-lane validity mask (t < T inside each Tp-sized chunk), built
    # in-kernel from a lane iota — removes two (1, N) HBM input streams.
    # Float "mod by constant" trick (no vector integer div/rem):
    #   chunk = floor((lane + 0.5) / Tp),  t = lane - chunk * Tp.
    lane = jax.lax.broadcasted_iota(jnp.int32, (1, nc), 1).astype(jnp.float32)
    chunk = jnp.floor((lane + 0.5) * (1.0 / seq_pad))
    t_in_chunk = lane - chunk * seq_pad
    valid = (t_in_chunk < (seq_len - 0.5)).astype(jnp.float32)       # (1, nc)

    # bf16 HBM stream, f32 compute.
    x = x_ref[...].astype(jnp.float32)                               # (idim, nc)

    # Linear(idim -> 24) + ReLU; zero the padded columns so the lane rolls
    # below pull genuine conv zero-padding across chunk boundaries.
    h = jnp.dot(wlin_ref[...], x, preferred_element_type=jnp.float32)
    h = jnp.maximum(h + blin_ref[...], 0.0) * valid                  # (24, nc)

    # Conv1d(24 -> 32, k=3, pad=1, no bias) + ReLU as ONE fused K=72 matmul.
    # Taps are written straight into persistent VMEM scratch at static
    # sublane offsets (no concatenate copies).
    tap1_ref[0:c_lin, :] = pltpu.roll(h, shift=prev_shift, axis=1)   # h[t-1]
    tap1_ref[c_lin:2 * c_lin, :] = h                                 # h[t]
    tap1_ref[2 * c_lin:3 * c_lin, :] = pltpu.roll(h, shift=next_shift, axis=1)
    y = jnp.dot(w1_ref[...], tap1_ref[...], preferred_element_type=jnp.float32)
    y = jnp.maximum(y, 0.0) * valid                                  # (32, nc)

    # Conv1d(32 -> 32, k=3, pad=1, no bias) + ReLU, fused K=96 matmul.
    tap2_ref[0:c1, :] = pltpu.roll(y, shift=prev_shift, axis=1)      # y[t-1]
    tap2_ref[c1:2 * c1, :] = y                                       # y[t]
    tap2_ref[2 * c1:3 * c1, :] = pltpu.roll(y, shift=next_shift, axis=1)
    z = jnp.dot(w2_ref[...], tap2_ref[...], preferred_element_type=jnp.float32)
    z = jnp.maximum(z, 0.0)                                          # (32, nc)

    # output_layer + (tanh(a)+1)/2 == sigmoid(2a); W_out / b_out were
    # pre-scaled by 2 in the wrapper.  W_out is sublane-padded to 8 rows
    # (row 0 is the real projection) -> lane-dense (1, nc) epilogue.
    o8 = jnp.dot(wout_ref[...], z, preferred_element_type=jnp.float32)   # (8, nc)
    a = o8[0:1, :] + bout_ref[...]
    o_ref[...] = pl.reciprocal(1.0 + jnp.exp(-a)).astype(o_ref.dtype)


# --------------------------------------------------------------------------
# Wrapper
# --------------------------------------------------------------------------
def duration_encoder_forward(x, params, *, max_lanes_per_step=4096):
    """x: (B, T, idim) float32 -> (B, T, 1) float32.

    max_lanes_per_step: lane-tile cap.  4096 is a safe default everywhere;
    v5e/v6e can go to 8192, v7x (64 MiB VMEM) prefers 2048-4096.
    """
    wlin, blin, w1, w2, wout, bout = params
    B, T, idim = x.shape
    c_lin = wlin.shape[1]                    # 24
    c1 = w1.shape[2]                         # 32
    c2 = w2.shape[2]                         # 32

    # Time padded to a lane multiple with AT LEAST ONE pad column (lane rolls
    # pull conv zero-padding from it); batch folded onto the lane axis:
    # column b*Tp + t holds x[b, t, :].
    Tp = pl.cdiv(T + 1, 128) * 128

    # Lane-tile selection: as fat as the cap allows; bc need not divide B
    # (batch is padded).  Only expose >=2 grid steps (v7x 2-TC sharding /
    # pipeline overlap) when each step keeps >= 512 lanes.
    bc = min(B, max(1, max_lanes_per_step // Tp))
    if B >= 2 and pl.cdiv(B, bc) < 2:
        bc_half = pl.cdiv(B, 2)
        if bc_half * Tp >= 512:
            bc = bc_half
    B_pad = pl.cdiv(B, bc) * bc
    Nc = bc * Tp
    N = B_pad * Tp
    grid = (B_pad // bc,)

    # x -> (idim, B_pad*Tp), bf16 stream (halves the dominant HBM traffic).
    xT = jnp.transpose(x, (2, 0, 1))                                 # (idim, B, T)
    xT = jnp.pad(xT, ((0, 0), (0, B_pad - B), (0, Tp - T)))          # (idim, B_pad, Tp)
    xT = xT.reshape(idim, N).astype(jnp.bfloat16)

    # Weights: time-on-lane layout, conv taps fused along the contraction dim,
    # output projection padded to 8 sublanes, epilogue folded into sigmoid(2a).
    wlin_t = wlin.T.astype(jnp.float32)                              # (24, idim)
    blin_c = blin.reshape(c_lin, 1).astype(jnp.float32)              # (24, 1)
    w1f = jnp.concatenate([w1[0].T, w1[1].T, w1[2].T], axis=1)       # (32, 72)
    w2f = jnp.concatenate([w2[0].T, w2[1].T, w2[2].T], axis=1)       # (32, 96)
    wout8 = jnp.zeros((8, c2), jnp.float32).at[0].set(2.0 * wout[:, 0])   # (8, 32)
    bout11 = (2.0 * bout).reshape(1, 1)

    prev_shift, next_shift = ((1, Nc - 1) if _roll_matches_jnp_convention()
                              else (Nc - 1, 1))
    kernel = functools.partial(_duration_encoder_kernel,
                               seq_pad=float(Tp), seq_len=float(T),
                               prev_shift=prev_shift, next_shift=next_shift)

    # Explicit VMEM budget: double-buffered x tile + tap scratches +
    # intermediates, with headroom; clamped so it also fits v7x's 64 MiB.
    est_bytes = (4 * idim + 1400) * Nc + (2 << 20)
    vmem_limit = int(min(max(2 * est_bytes, 32 << 20), 48 << 20))

    out_flat = pl.pallas_call(
        kernel,
        out_shape=jax.ShapeDtypeStruct((1, N), jnp.float32),
        grid_spec=pltpu.PrefetchScalarGridSpec(
            num_scalar_prefetch=0,
            grid=grid,
            in_specs=[
                pl.BlockSpec((idim, Nc), lambda i: (0, i)),          # x (bf16)
                pl.BlockSpec((c_lin, idim), lambda i: (0, 0)),       # W_lin^T
                pl.BlockSpec((c_lin, 1), lambda i: (0, 0)),          # b_lin
                pl.BlockSpec((c1, 3 * c_lin), lambda i: (0, 0)),     # W1 fused
                pl.BlockSpec((c2, 3 * c1), lambda i: (0, 0)),        # W2 fused
                pl.BlockSpec((8, c2), lambda i: (0, 0)),             # 2*W_out (padded)
                pl.BlockSpec((1, 1), lambda i: (0, 0)),              # 2*b_out
            ],
            out_specs=pl.BlockSpec((1, Nc), lambda i: (0, i)),
            scratch_shapes=[
                pltpu.VMEM((3 * c_lin, Nc), jnp.float32),            # conv1 taps (72, Nc)
                pltpu.VMEM((3 * c1, Nc), jnp.float32),               # conv2 taps (96, Nc)
            ],
        ),
        compiler_params=pltpu.CompilerParams(
            dimension_semantics=("parallel",),
            vmem_limit_bytes=vmem_limit),
    )(xT, wlin_t, blin_c, w1f, w2f, wout8, bout11)

    return out_flat.reshape(B_pad, Tp)[:B, :T][..., None]            # (B, T, 1)


# --------------------------------------------------------------------------
# Parameter construction (mirrors the PyTorch module's init shapes)
# --------------------------------------------------------------------------
def init_params(key, idim):
    """Conv1d weights: Xavier-uniform with relu gain (encoder_init); Linear
    layers: PyTorch default uniform(-1/sqrt(fan_in), +1/sqrt(fan_in)).

    Math-friendly layouts:
      W_lin: (idim, 24), b_lin: (1, 24),
      W1: (3, 24, 32)  [tap, cin, cout],  W2: (3, 32, 32),
      W_out: (32, 1),  b_out: (1, 1).
    """
    k = jax.random.split(key, 6)
    lin_bound = 1.0 / math.sqrt(idim)
    wlin = jax.random.uniform(k[0], (idim, 24), jnp.float32, -lin_bound, lin_bound)
    blin = jax.random.uniform(k[1], (1, 24), jnp.float32, -lin_bound, lin_bound)
    gain = math.sqrt(2.0)
    b1 = gain * math.sqrt(6.0 / (24 * 3 + 32 * 3))
    w1 = jax.random.uniform(k[2], (3, 24, 32), jnp.float32, -b1, b1)
    b2 = gain * math.sqrt(6.0 / (32 * 3 + 32 * 3))
    w2 = jax.random.uniform(k[3], (3, 32, 32), jnp.float32, -b2, b2)
    out_bound = 1.0 / math.sqrt(32)
    wout = jax.random.uniform(k[4], (32, 1), jnp.float32, -out_bound, out_bound)
    bout = jax.random.uniform(k[5], (1, 1), jnp.float32, -out_bound, out_bound)
    return wlin, blin, w1, w2, wout, bout


# --------------------------------------------------------------------------
# Pure-JAX reference (same semantics as the PyTorch module)
# --------------------------------------------------------------------------
def reference_forward(x, params):
    wlin, blin, w1, w2, wout, bout = params

    def one(xb):  # (T, idim)
        T = xb.shape[0]
        h = jnp.maximum(xb @ wlin + blin, 0.0)
        hp = jnp.pad(h, ((1, 1), (0, 0)))
        y = sum(hp[k:k + T] @ w1[k] for k in range(3))
        y = jnp.maximum(y, 0.0)
        yp = jnp.pad(y, ((1, 1), (0, 0)))
        z = sum(yp[k:k + T] @ w2[k] for k in range(3))
        z = jnp.maximum(z, 0.0)
        out = jnp.tanh(z @ wout + bout)
        return (out + 1.0) / 2.0

    return jax.vmap(one)(x)


if __name__ == "__main__":
    key = jax.random.PRNGKey(0)
    B, T, idim = 2, 8, 5           # (B, Tmax, feature_len)
    kx, kp = jax.random.split(key)
    x = jax.random.normal(kx, (B, T, idim), jnp.float32)
    params = init_params(kp, idim)

    out = duration_encoder_forward(x, params)
    out = jax.block_until_ready(out)

    # The kernel streams x as bf16 (all compute in f32); compare against the
    # module's exact math on the identically-rounded input.
    x_stream = x.astype(jnp.bfloat16).astype(jnp.float32)
    ref = reference_forward(x_stream, params)
    assert out.shape == (B, T, 1)
    assert jnp.allclose(out, ref, atol=1e-4, rtol=1e-5), "mismatch vs reference"
    print("KERNEL_OK")
</pallas_src>

<mosaic_0001>
module attributes {stable_mosaic.version = 11 : i64} {
  func.func @_roll_probe_kernel(%arg0: memref<8x128xf32, #tpu.memory_space<vmem>>, %arg1: memref<8x128xf32, #tpu.memory_space<vmem>>) attributes {dimension_semantics = [], scalar_prefetch = 0 : i64, scratch_operands = 0 : i64, tpu.core_type = #tpu.core_type<tc>} {
    %c0 = arith.constant 0 : index
    %c0_0 = arith.constant 0 : index
    %0 = vector.load %arg0[%c0, %c0_0] : memref<8x128xf32, #tpu.memory_space<vmem>>, vector<8x128xf32>
    %c1_i32 = arith.constant 1 : i32
    %1 = tpu.dynamic_rotate %0 by %c1_i32 dim 1 : vector<8x128xf32>, i32 -> vector<8x128xf32>
    %c0_1 = arith.constant 0 : index
    %c0_2 = arith.constant 0 : index
    %2 = vector.load %arg1[%c0_1, %c0_2] : memref<8x128xf32, #tpu.memory_space<vmem>>, vector<8x128xf32>
    tpu.vector_store %arg1[%c0_1, %c0_2], %1 {strides = array<i32>} : memref<8x128xf32, #tpu.memory_space<vmem>>, vector<8x128xf32>,
    return
  }
}

</mosaic_0001>

<bundles_post_ra>
// kernel: tpu_custom_call.1
= control target key start
LH: loop header
LB: loop body
LE: loop exit
PB: predicated region body
PF: predicated region fallthrough
CT: control target
= control target key end

     0   :  { %6 = vsyncpa [#allocation3], 0  ;;  %s128_s0 = inlined_call_operand.hbm [shape: f32[8,128], index: 0, kind: input, shape index: {}]   ;;  %s129_s1 = inlined_call_operand.hbm [shape: f32[8,128], index: 1, kind: output, shape index: {}]  }
   0x1   :  { %7 = vsyncpa [#allocation4], 0  ;;  %s91_s6 = smov [#allocation2]   ;;  %s43_s10 = scalar_lea.hbm %s128_s0, 128 }
   0x2   :  { %s14_s7 = sshll.u32 %s91_s6, 4  ;;  %p44_p0 = scmp.ne.s32.totalorder %s128_s0, %s43_s10  ;;  %s15_s7 = int_to_ptr.vmem [resolvable:$true] %s14_s7 }
   0x3   :  { %p47_p1 = scmp.lt.u32.totalorder %s43_s10, %s128_s0 }
   0x5   :  { %p49_p2 = pnand %p47_p1, %p44_p0 }
   0x7   :  { %52 = shalt.err (!%p49_p2)
}
   0x8   :  { %s53_s15 = scalar_lea.vmem %s15_s7, 128  ;;  %p58_p4 = scmp.lt.s32.totalorder %s15_s7, %s15_s7 }
   0x9   :  { %p54_p3 = scmp.ne.s32.totalorder %s15_s7, %s53_s15  ;;  %p59_p5 = scmp.lt.s32.totalorder %s53_s15, %s53_s15 }
   0xb   :  { %p60_p6 = por %p59_p5, %p58_p4 }
   0xd   :  { %p61_p7 = pnand %p60_p6, %p54_p3 }
   0xf   :  { %64 = shalt.err (!%p61_p7)
}
  0x10   :  { %17 = dma.hbm_to_vmem [thread:$0]  %s128_s0, 128, %s15_s7, [#allocation3]  }
  0x11   :  { %87 = dma.done.wait [#allocation3], 128  }
  0x12   :  { %88 = vsyncadd [#allocation3], 4294967168  ;;  %v21_v0 = vld [vmem:[#allocation2] sm:$0xff]  ;;  %s92_s18 = smov 1   ;;  %s93_s19 = smov [#allocation5]  }
  0x13   :  { %22 = vrot.lane.b32.xlu0 %v21_v0, %s92_s18  ;;  %s31_s20 = sshll.u32 %s93_s19, 4  ;;  %s32_s20 = int_to_ptr.vmem [resolvable:$true] %s31_s20 }
  0x14   :  { %s65_s21 = scalar_lea.vmem %s32_s20, 128  ;;  %p70_p9 = scmp.lt.s32.totalorder %s32_s20, %s32_s20 }
  0x15   :  { %p66_p8 = scmp.ne.s32.totalorder %s32_s20, %s65_s21  ;;  %p71_p10 = scmp.lt.s32.totalorder %s65_s21, %s65_s21 }
  0x17   :  { %p72_p11 = por %p71_p10, %p70_p9 }
  0x19   :  { %p73_p12 = pnand %p72_p11, %p66_p8 }
  0x85   :  { %v23_v1 = vpop.permute.xlu0 %22 }
  0x86   :  { %24 = vst [vmem:[#allocation5] sm:$0xff] %v23_v1 }
  0x87   :  { %76 = shalt.err (!%p73_p12)
}
  0x88   :  { %s77_s0 = scalar_lea.hbm %s129_s1, 128 }
  0x89   :  { %p78_p13 = scmp.ne.s32.totalorder %s129_s1, %s77_s0  ;;  %p81_p0 = scmp.lt.u32.totalorder %s77_s0, %s129_s1 }
  0x8b   :  { %p83_p1 = pnand %p81_p0, %p78_p13 }
  0x8d   :  { %86 = shalt.err (!%p83_p1)
}
  0x8e   :  { %34 = dma.vmem_to_hbm [thread:$0]  %s32_s20, 128, %s129_s1, [#allocation4]  }
  0x8f   :  { %89 = dma.done.wait [#allocation4], 128  }
  0x90   :  { %90 = vsyncadd [#allocation4], 4294967168 }
  0x91   :  { %38 = vsyncpa [#allocation3], 1 }
  0x92   :  { %39 = vsyncpa [#allocation4], 1 }

</bundles_post_ra>
